<compile_context>
chip_gen: v7x
topology: tpu7x:2x2x1
jax: 0.10.0
libtpu: 0.0.40
codegen_flags: <defaults>
</compile_context>

<pallas_src>
import functools

import jax
import jax.numpy as jnp
from jax import lax
from jax.experimental import pallas as pl
from jax.experimental.pallas import tpu as pltpu


def _vq_kernel(z_ref, w_ref, wt_ref, zq_ref, idx_ref, loss_ref, bins_ref, *,
               bf16_scores):
    # z block: (1, C, P) slab of the NCHW-flattened input; work on (C, P):
    # channels on sublanes, spatial positions on lanes.
    z = z_ref[0].astype(jnp.float32)               # (C, P)
    w = w_ref[...].astype(jnp.float32)             # (K, C) unit-norm codebook rows
    wt = wt_ref[...].astype(jnp.float32)           # (C, K) transposed codebook
    k = w.shape[0]
    p = z.shape[1]

    # F.normalize along the channel axis (eps=1e-12 clamp, matches torch).
    nrm = jnp.sqrt(jnp.sum(z * z, axis=0, keepdims=True))        # (1, P)
    zn = z / jnp.maximum(nrm, 1e-12)                             # (C, P)

    # Cosine similarity.  Both zn columns and codebook rows are unit norm, so
    # argmin(||zn||^2 + ||w||^2 - 2 zn.w) == argmax(zn.w): the squared-norm
    # terms and the explicit distance expansion are dropped.
    if bf16_scores:
        # bf16 MXU operands, f32 accumulation (v6e/v7x native-rate path);
        # only risk is an argmax flip at near-ties.
        cross = lax.dot_general(w.astype(jnp.bfloat16), zn.astype(jnp.bfloat16),
                                (((1,), (0,)), ((), ())),
                                preferred_element_type=jnp.float32)   # (K, P)
    else:
        cross = lax.dot_general(w, zn, (((1,), (0,)), ((), ())),
                                preferred_element_type=jnp.float32)   # (K, P)

    # argmax over the codebook (sublane) axis with first-index tie-break
    # (== torch.argmin of the distance).  The iota is reused for the one-hot.
    kiota = lax.broadcasted_iota(jnp.int32, (k, p), 0)
    best = jnp.max(cross, axis=0, keepdims=True)                      # (1, P)
    idx = jnp.min(jnp.where(cross == best, kiota, k),
                  axis=0, keepdims=True)                              # (1, P)

    # exact codebook-row gather on the MXU via a one-hot matmul (f32).
    enc = (kiota == idx).astype(jnp.float32)                          # (K, P)
    z_q = lax.dot_general(wt, enc, (((1,), (0,)), ((), ())),
                          preferred_element_type=jnp.float32)         # (C, P)

    zq_ref[...] = z_q[None].astype(zq_ref.dtype)                      # NCHW block
    idx_ref[...] = idx[None]                                          # lane-dense row

    # per-position partial loss (summed over channels) as a lane-dense row;
    # final mean / EMA reductions happen in the wrapper so both grid axes
    # stay "parallel".
    diff = z_q - zn
    loss_ref[...] = jnp.sum(diff * diff, axis=0, keepdims=True)[None]

    # partial bins as a lane-dense (1, K) row via a tiny ones @ enc^T matmul.
    ones = jnp.ones((1, p), jnp.float32)
    bins = lax.dot_general(ones, enc, (((1,), (1,)), ((), ())),
                           preferred_element_type=jnp.float32)        # (1, K)
    bins_ref[...] = bins[None, None]


def _pick_tile_p(hw, b, c, k, vmem_limit_bytes):
    """Largest spatial tile (multiple of 128, dividing H*W) that fits VMEM."""
    if hw % 128 != 0:
        return hw                       # full-dim block is always legal
    cb_bytes = 2 * 2 * k * c * 4        # w + w^T, each double-buffered
    per_p = 4 * (6 * c + 2 * k) + 16    # z/z_q dbuf + zn/diff + cross/enc + rows
    budget = int(vmem_limit_bytes * 0.6) - cb_bytes
    p_cap = max(128, budget // per_p) if budget > 0 else 128
    tp = min(hw, (p_cap // 128) * 128, 4096)
    if b == 1 and hw >= 256:
        # keep both v7x TensorCores busy when the batch axis is degenerate
        tp = min(tp, max(128, (hw // 2 // 128) * 128))
    tp = max(tp, 128)
    while hw % tp != 0:
        tp -= 128
    return tp


def norm_ema_vq_forward(z_nchw, codebook, cluster_size, *, beta=0.25,
                        decay=0.99, bf16_scores=True, tile_p=None,
                        vmem_limit_bytes=None):
    """Forward of NormEMAVectorQuantizer (eval mode).

    z_nchw:       (B, C, H, W) float32/bfloat16
    codebook:     (n_embed, C) float32 (l2-normalized rows)
    cluster_size: (n_embed,)   float32 buffer
    returns: z_q (B, C, H, W), loss (scalar), encoding_indices (B*H*W,),
             new_cluster_size (n_embed,)
    """
    B, C, H, W = z_nchw.shape
    K, D = codebook.shape
    assert C == D, "embedding_dim must equal channel dim"
    HW = H * W
    N = B * HW

    if vmem_limit_bytes is None:
        try:
            cap = int(pltpu.get_tpu_info().vmem_capacity_bytes)
        except Exception:
            cap = 64 * 1024 * 1024
        # ~52 MiB on v7x (64 MiB physical), capped at ~100 MiB on v5e/v6e.
        vmem_limit_bytes = min(max(cap - 12 * 1024 * 1024, 32 * 1024 * 1024),
                               100 * 1024 * 1024)
    vmem_limit_bytes = int(vmem_limit_bytes)

    if tile_p is None:
        tile_p = _pick_tile_p(HW, B, C, K, vmem_limit_bytes)
    tile_p = int(tile_p)
    assert HW % tile_p == 0, "tile_p must divide H*W"
    n_ptiles = HW // tile_p

    # NCHW -> (B, C, H*W): contiguous view, no transpose / no extra HBM pass.
    z3 = z_nchw.reshape(B, C, HW)
    w32 = codebook.astype(jnp.float32)              # (K, C)
    wt32 = jnp.transpose(w32)                       # (C, K) tiny one-time transpose

    out_dtype = jnp.bfloat16 if z_nchw.dtype == jnp.bfloat16 else jnp.float32
    out_bytes = 2 if out_dtype == jnp.bfloat16 else 4

    kernel = functools.partial(_vq_kernel, bf16_scores=bool(bf16_scores))

    flops = 4 * N * K * C + 6 * N * C
    bytes_accessed = (N * C * (z_nchw.dtype.itemsize + out_bytes)
                      + 2 * K * C * 4 + 2 * N * 4 + B * n_ptiles * K * 4)

    zq3, idx3, loss_part, bins_part = pl.pallas_call(
        kernel,
        grid=(B, n_ptiles),
        in_specs=[
            pl.BlockSpec((1, C, tile_p), lambda b, p: (b, 0, p)),   # z block (NCHW)
            pl.BlockSpec((K, C), lambda b, p: (0, 0)),              # resident codebook
            pl.BlockSpec((C, K), lambda b, p: (0, 0)),              # resident codebook^T
        ],
        out_specs=(
            pl.BlockSpec((1, C, tile_p), lambda b, p: (b, 0, p)),   # z_q block (NCHW)
            pl.BlockSpec((1, 1, tile_p), lambda b, p: (b, 0, p)),   # indices (lane-dense)
            pl.BlockSpec((1, 1, tile_p), lambda b, p: (b, 0, p)),   # partial loss
            pl.BlockSpec((1, 1, 1, K), lambda b, p: (b, p, 0, 0)),  # partial bins
        ),
        out_shape=(
            jax.ShapeDtypeStruct((B, C, HW), out_dtype),
            jax.ShapeDtypeStruct((B, 1, HW), jnp.int32),
            jax.ShapeDtypeStruct((B, 1, HW), jnp.float32),
            jax.ShapeDtypeStruct((B, n_ptiles, 1, K), jnp.float32),
        ),
        compiler_params=pltpu.CompilerParams(
            dimension_semantics=("parallel", "parallel"),
            vmem_limit_bytes=vmem_limit_bytes,
        ),
        cost_estimate=pl.CostEstimate(flops=int(flops), transcendentals=int(N),
                                      bytes_accessed=int(bytes_accessed)),
    )(z3, w32, wt32)

    # crop-free: nothing was padded.  Reshapes below are contiguous views.
    z_q = zq3.reshape(B, C, H, W)                       # already NCHW
    indices = idx3.reshape(N)                           # (b, h, w) order == torch
    loss = (beta / (N * C)) * jnp.sum(loss_part)
    bins = jnp.sum(bins_part, axis=(0, 1, 2))           # (K,)
    new_cs = cluster_size.astype(jnp.float32) * decay + (1.0 - decay) * bins

    # straight-through estimator: z_q = z + (z_q - z).detach() -> value is z_q
    return z_q, loss, indices, new_cs


def _reference(z_nchw, codebook, cluster_size, beta=0.25, decay=0.99):
    z = jnp.transpose(z_nchw, (0, 2, 3, 1))
    z = z / jnp.maximum(jnp.linalg.norm(z, axis=-1, keepdims=True), 1e-12)
    zf = z.reshape(-1, codebook.shape[1])
    cross = jnp.dot(zf, codebook.T, precision=jax.lax.Precision.HIGHEST)
    d = (jnp.sum(zf ** 2, axis=1, keepdims=True)
         + jnp.sum(codebook ** 2, axis=1) - 2.0 * cross)
    idx = jnp.argmin(d, axis=1)
    z_q = codebook[idx].reshape(z.shape)
    loss = beta * jnp.mean((z_q - z) ** 2)
    bins = jnp.sum(jax.nn.one_hot(idx, codebook.shape[0], dtype=jnp.float32), axis=0)
    new_cs = cluster_size * decay + (1.0 - decay) * bins
    return jnp.transpose(z_q, (0, 3, 1, 2)), loss, idx, new_cs


if __name__ == "__main__":
    # module config (small, deterministic)
    n_embed, embedding_dim = 64, 32
    beta, decay = 0.25, 0.99
    B, H, W = 2, 8, 8

    key = jax.random.PRNGKey(0)
    kz, kw = jax.random.split(key)

    # input z: NCHW
    z = jax.random.normal(kz, (B, embedding_dim, H, W), dtype=jnp.float32)

    # EmbeddingEMA init with kmeans_init=False: weight = l2norm(randn(K, D))
    w = jax.random.normal(kw, (n_embed, embedding_dim), dtype=jnp.float32)
    w = w / jnp.maximum(jnp.linalg.norm(w, axis=-1, keepdims=True), 1e-12)

    cluster_size = jnp.zeros((n_embed,), dtype=jnp.float32)

    # exact-parity run (f32 scoring) against the pure-JAX reference
    z_q, loss, indices, new_cs = norm_ema_vq_forward(
        z, w, cluster_size, beta=beta, decay=decay, bf16_scores=False)
    jax.block_until_ready((z_q, loss, indices, new_cs))

    zq_r, loss_r, idx_r, cs_r = _reference(z, w, cluster_size, beta, decay)
    assert z_q.shape == (B, embedding_dim, H, W)
    assert jnp.allclose(z_q, zq_r, atol=1e-5, rtol=1e-5)
    assert jnp.allclose(loss, loss_r, atol=1e-5, rtol=1e-4)
    assert jnp.array_equal(indices, idx_r.astype(indices.dtype))
    assert jnp.allclose(new_cs, cs_r, atol=1e-5, rtol=1e-5)

    # default fast path (bf16 scoring matmul, f32 gather): argmax may flip at
    # exact near-ties, so check loosely but still exercise the default config.
    z_q2, loss2, indices2, new_cs2 = norm_ema_vq_forward(
        z, w, cluster_size, beta=beta, decay=decay)
    jax.block_until_ready((z_q2, loss2, indices2, new_cs2))
    assert z_q2.shape == (B, embedding_dim, H, W)
    assert bool(jnp.isfinite(loss2))
    match = float(jnp.mean((indices2 == indices).astype(jnp.float32)))
    assert match >= 0.9

    print("KERNEL_OK")
</pallas_src>

<mosaic_0001>
module attributes {stable_mosaic.version = 11 : i64} {
  func.func @_vq_kernel(%arg0: i32, %arg1: i32, %arg2: memref<1x32x64xf32, #tpu.memory_space<vmem>>, %arg3: memref<64x32xf32, #tpu.memory_space<vmem>>, %arg4: memref<32x64xf32, #tpu.memory_space<vmem>>, %arg5: memref<1x32x64xf32, #tpu.memory_space<vmem>>, %arg6: memref<1x1x64xi32, #tpu.memory_space<vmem>>, %arg7: memref<1x1x64xf32, #tpu.memory_space<vmem>>, %arg8: memref<1x1x1x64xf32, #tpu.memory_space<vmem>>) attributes {dimension_semantics = [#tpu.dimension_semantics<parallel>, #tpu.dimension_semantics<parallel>], iteration_bounds = array<i64: 2, 1>, scalar_prefetch = 0 : i64, scratch_operands = 0 : i64, tpu.core_type = #tpu.core_type<tc>, window_params = [{transform_indices = @transform_0, window_bounds = array<i64: 1, 32, 64>}, {pipeline_mode = #tpu.pipeline_mode<synchronous>, transform_indices = @transform_1, window_bounds = array<i64: 64, 32>}, {pipeline_mode = #tpu.pipeline_mode<synchronous>, transform_indices = @transform_2, window_bounds = array<i64: 32, 64>}, {transform_indices = @transform_3, window_bounds = array<i64: 1, 32, 64>}, {transform_indices = @transform_4, window_bounds = array<i64: 1, 1, 64>}, {transform_indices = @transform_5, window_bounds = array<i64: 1, 1, 64>}, {transform_indices = @transform_6, window_bounds = array<i64: 1, 1, 1, 64>}]} {
    %c0 = arith.constant 0 : index
    %c0_0 = arith.constant 0 : index
    %c0_1 = arith.constant 0 : index
    %0 = vector.load %arg2[%c0, %c0_0, %c0_1] : memref<1x32x64xf32, #tpu.memory_space<vmem>>, vector<1x32x64xf32>
    %1 = vector.shape_cast %0 : vector<1x32x64xf32> to vector<32x64xf32>
    %c0_2 = arith.constant 0 : index
    %c0_3 = arith.constant 0 : index
    %2 = vector.load %arg3[%c0_2, %c0_3] : memref<64x32xf32, #tpu.memory_space<vmem>>, vector<64x32xf32>
    %c0_4 = arith.constant 0 : index
    %c0_5 = arith.constant 0 : index
    %3 = vector.load %arg4[%c0_4, %c0_5] : memref<32x64xf32, #tpu.memory_space<vmem>>, vector<32x64xf32>
    %4 = arith.mulf %1, %1 : vector<32x64xf32>
    %cst = arith.constant dense<0.000000e+00> : vector<64xf32>
    %5 = vector.multi_reduction <add>, %4, %cst [0] : vector<32x64xf32> to vector<64xf32>
    %6 = vector.shape_cast %5 : vector<64xf32> to vector<1x64xf32>
    %7 = math.sqrt %6 : vector<1x64xf32>
    %cst_6 = arith.constant 9.99999996E-13 : f32
    %8 = vector.broadcast %cst_6 : f32 to vector<1x64xf32>
    %9 = arith.maximumf %7, %8 : vector<1x64xf32>
    %10 = vector.broadcast %9 : vector<1x64xf32> to vector<32x64xf32>
    %11 = arith.divf %1, %10 : vector<32x64xf32>
    %cst_7 = arith.constant dense<0.000000e+00> : vector<64x64xf32>
    %12 = tpu.matmul %2, %11, %cst_7 {dimension_numbers = #tpu.dot_dimension_numbers<[1], [0], [0], [1], [0, 0, 1, 1], [], []>} : vector<64x32xf32>, vector<32x64xf32>, vector<64x64xf32> -> vector<64x64xf32>
    %13 = tpu.iota {dimensions = array<i32: 0>} : vector<64x64xi32>
    %cst_8 = arith.constant dense<0xFF800000> : vector<64xf32>
    %14 = vector.multi_reduction <maximumf>, %12, %cst_8 [0] : vector<64x64xf32> to vector<64xf32>
    %15 = vector.shape_cast %14 : vector<64xf32> to vector<1x64xf32>
    %16 = vector.broadcast %15 : vector<1x64xf32> to vector<64x64xf32>
    %17 = arith.cmpf oeq, %12, %16 : vector<64x64xf32>
    %c64_i32 = arith.constant 64 : i32
    %18 = vector.broadcast %c64_i32 : i32 to vector<64x64xi32>
    %19 = arith.select %17, %13, %18 : vector<64x64xi1>, vector<64x64xi32>
    %cst_9 = arith.constant dense<2147483647> : vector<64xi32>
    %20 = vector.multi_reduction <minsi>, %19, %cst_9 [0] : vector<64x64xi32> to vector<64xi32>
    %21 = vector.shape_cast %20 : vector<64xi32> to vector<1x64xi32>
    %22 = vector.broadcast %21 : vector<1x64xi32> to vector<64x64xi32>
    %23 = arith.cmpi eq, %13, %22 : vector<64x64xi32>
    %24 = arith.extui %23 : vector<64x64xi1> to vector<64x64xi32>
    %25 = arith.sitofp %24 : vector<64x64xi32> to vector<64x64xf32>
    %cst_10 = arith.constant dense<0.000000e+00> : vector<32x64xf32>
    %26 = tpu.matmul %3, %25, %cst_10 {dimension_numbers = #tpu.dot_dimension_numbers<[1], [0], [0], [1], [0, 0, 1, 1], [], []>} : vector<32x64xf32>, vector<64x64xf32>, vector<32x64xf32> -> vector<32x64xf32>
    %27 = vector.shape_cast %26 : vector<32x64xf32> to vector<1x32x64xf32>
    %c0_11 = arith.constant 0 : index
    %c0_12 = arith.constant 0 : index
    %c0_13 = arith.constant 0 : index
    %28 = vector.load %arg5[%c0_11, %c0_12, %c0_13] : memref<1x32x64xf32, #tpu.memory_space<vmem>>, vector<1x32x64xf32>
    tpu.vector_store %arg5[%c0_11, %c0_12, %c0_13], %27 {strides = array<i32>} : memref<1x32x64xf32, #tpu.memory_space<vmem>>, vector<1x32x64xf32>,
    %29 = vector.shape_cast %21 : vector<1x64xi32> to vector<1x1x64xi32>
    %c0_14 = arith.constant 0 : index
    %c0_15 = arith.constant 0 : index
    %c0_16 = arith.constant 0 : index
    %30 = vector.load %arg6[%c0_14, %c0_15, %c0_16] : memref<1x1x64xi32, #tpu.memory_space<vmem>>, vector<1x1x64xi32>
    tpu.vector_store %arg6[%c0_14, %c0_15, %c0_16], %29 {strides = array<i32>} : memref<1x1x64xi32, #tpu.memory_space<vmem>>, vector<1x1x64xi32>,
    %31 = arith.subf %26, %11 : vector<32x64xf32>
    %32 = arith.mulf %31, %31 : vector<32x64xf32>
    %cst_17 = arith.constant dense<0.000000e+00> : vector<64xf32>
    %33 = vector.multi_reduction <add>, %32, %cst_17 [0] : vector<32x64xf32> to vector<64xf32>
    %34 = vector.shape_cast %33 : vector<64xf32> to vector<1x64xf32>
    %35 = vector.shape_cast %34 : vector<1x64xf32> to vector<1x1x64xf32>
    %c0_18 = arith.constant 0 : index
    %c0_19 = arith.constant 0 : index
    %c0_20 = arith.constant 0 : index
    %36 = vector.load %arg7[%c0_18, %c0_19, %c0_20] : memref<1x1x64xf32, #tpu.memory_space<vmem>>, vector<1x1x64xf32>
    tpu.vector_store %arg7[%c0_18, %c0_19, %c0_20], %35 {strides = array<i32>} : memref<1x1x64xf32, #tpu.memory_space<vmem>>, vector<1x1x64xf32>,
    %cst_21 = arith.constant 1.000000e+00 : f32
    %37 = vector.broadcast %cst_21 : f32 to vector<1x64xf32>
    %cst_22 = arith.constant dense<0.000000e+00> : vector<1x64xf32>
    %38 = tpu.matmul %37, %25, %cst_22 {dimension_numbers = #tpu.dot_dimension_numbers<[1], [1], [0], [0], [0, 0, 1, 0], [], []>} : vector<1x64xf32>, vector<64x64xf32>, vector<1x64xf32> -> vector<1x64xf32>
    %39 = vector.shape_cast %38 : vector<1x64xf32> to vector<1x1x1x64xf32>
    %c0_23 = arith.constant 0 : index
    %c0_24 = arith.constant 0 : index
    %c0_25 = arith.constant 0 : index
    %c0_26 = arith.constant 0 : index
    %40 = vector.load %arg8[%c0_23, %c0_24, %c0_25, %c0_26] : memref<1x1x1x64xf32, #tpu.memory_space<vmem>>, vector<1x1x1x64xf32>
    tpu.vector_store %arg8[%c0_23, %c0_24, %c0_25, %c0_26], %39 {strides = array<i32>} : memref<1x1x1x64xf32, #tpu.memory_space<vmem>>, vector<1x1x1x64xf32>,
    return
  }
  func.func @transform_0(%arg0: i32, %arg1: i32) -> (i32, i32, i32) {
    %c0_i32 = arith.constant 0 : i32
    %c0_i32_0 = arith.constant 0 : i32
    return %arg0, %c0_i32, %arg1 : i32, i32, i32
  }
  func.func @transform_1(%arg0: i32, %arg1: i32) -> (i32, i32) {
    %c0_i32 = arith.constant 0 : i32
    %c0_i32_0 = arith.constant 0 : i32
    %c0_i32_1 = arith.constant 0 : i32
    return %c0_i32, %c0_i32_0 : i32, i32
  }
  func.func @transform_2(%arg0: i32, %arg1: i32) -> (i32, i32) {
    %c0_i32 = arith.constant 0 : i32
    %c0_i32_0 = arith.constant 0 : i32
    %c0_i32_1 = arith.constant 0 : i32
    return %c0_i32, %c0_i32_0 : i32, i32
  }
  func.func @transform_3(%arg0: i32, %arg1: i32) -> (i32, i32, i32) {
    %c0_i32 = arith.constant 0 : i32
    %c0_i32_0 = arith.constant 0 : i32
    return %arg0, %c0_i32, %arg1 : i32, i32, i32
  }
  func.func @transform_4(%arg0: i32, %arg1: i32) -> (i32, i32, i32) {
    %c0_i32 = arith.constant 0 : i32
    %c0_i32_0 = arith.constant 0 : i32
    return %arg0, %c0_i32, %arg1 : i32, i32, i32
  }
  func.func @transform_5(%arg0: i32, %arg1: i32) -> (i32, i32, i32) {
    %c0_i32 = arith.constant 0 : i32
    %c0_i32_0 = arith.constant 0 : i32
    return %arg0, %c0_i32, %arg1 : i32, i32, i32
  }
  func.func @transform_6(%arg0: i32, %arg1: i32) -> (i32, i32, i32, i32) {
    %c0_i32 = arith.constant 0 : i32
    %c0_i32_0 = arith.constant 0 : i32
    %c0_i32_1 = arith.constant 0 : i32
    return %arg0, %arg1, %c0_i32, %c0_i32_0 : i32, i32, i32, i32
  }
}

</mosaic_0001>

<bundles_post_ra>
// kernel: tpu_custom_call.1
= control target key start
LH: loop header
LB: loop body
LE: loop exit
PB: predicated region body
PF: predicated region fallthrough
CT: control target
= control target key end

     0   :  { %12 = vsyncpa [#allocation3], 0  ;;  %s1927_s0 = inlined_call_operand.vmem [shape: f32[2,32,64], index: 0, kind: input, shape index: {}]   ;;  %s1928_s1 = inlined_call_operand.vmem [shape: f32[64,32], index: 1, kind: input, shape index: {}]   ;;  %s1929_s2 = inlined_call_operand.vmem [shape: f32[32,64], index: 2, kind: input, shape index: {}]   ;;  %s1930_s3 = inlined_call_operand.hbm [shape: f32[2,32,64], index: 3, kind: output, shape index: {0}]   ;;  %s1931_s4 = inlined_call_operand.hbm [shape: s32[2,1,64], index: 4, kind: output, shape index: {1}]   ;;  %s1932_s5 = inlined_call_operand.hbm [shape: f32[2,1,64], index: 5, kind: output, shape index: {2}]   ;;  %s1933_s6 = inlined_call_operand.hbm [shape: f32[2,1,1,64], index: 6, kind: output, shape index: {3}]  }
   0x1   :  { %14 = vsyncpa [#allocation3 + $0x1], 0 }
   0x2   :  { %15 = vsyncpa [#allocation5], 0 }
   0x3   :  { %17 = vsyncpa [#allocation5 + $0x1], 0 }
   0x4   :  { %18 = vsyncpa [#allocation8], 0 }
   0x5   :  { %20 = vsyncpa [#allocation8 + $0x1], 0  ;;  %s1526_s21 = smov 0   ;;  %s1528_s22 = smov 0  }
   0x6   :  { %s1530_s23 = smov 0   ;;  %s1532_s24 = smov 0  }
   0x7   :  { %s1534_s25 = smov 0   ;;  %s1536_s26 = smov 0  }
   0x8 LB: > { %s1038_s27 = sadd.s32 4294967295, %s1478_s26   ;;  %s1934_s28 = sadd.s32 4294967294, %s1478_s26   ;;  %s1478_s26 = sphi %s1536_s26, %s26_s26   ;;  %s1474_s25 = sphi %s1534_s25, %s1944_s25   ;;  %s1470_s24 = sphi %s1532_s24, %s1943_s24   ;;  %s1466_s23 = sphi %s1530_s23, %s1942_s23   ;;  %s1462_s22 = sphi %s1528_s22, %s1941_s22   ;;  %s1458_s21 = sphi %s1526_s21, %s1940_s21  }
   0x9   : > { %s38_s29 = sadd.s32 1, %s1474_s25  ;;  %s117_s30 = sadd.s32 1, %s1466_s23 }
   0xa   : > { %p40_p0 = scmp.ge.s32.totalorder %s38_s29, 2  ;;  %p127_p1 = scmp.ne.s32.totalorder %s1466_s23, %s1462_s22 }
   0xb   : > { %p128_p2 = scmp.eq.s32.totalorder %s1038_s27, 1  ;;  %p133_p3 = scmp.ne.s32.totalorder %s1462_s22, %s1458_s21 }
   0xc   : > { %s1946_s29 = smov (%p40_p0, %s38_s29), 0  ;;  %p134_p5 = scmp.eq.s32.totalorder %s1934_s28, 1 }
   0xd   : > { %p1568_p4 = por %p128_p2, %p127_p1  ;;  %s112_s8 = ssub.s32 %s1474_s25, %s1946_s29 }
   0xe   : > { %p1042_p6 = scmp.ge.s32.totalorder %s1478_s26, 1  ;;  %p115_p7 = scmp.eq.s32.totalorder %s112_s8, 0 }
   0xf   : > { %p1577_p8 = por %p134_p5, %p133_p3  ;;  %p253_p9 = scmp.lt.s32.totalorder %s1478_s26, 3 }
  0x10   : > { %s1583_s10 = scalar_select %p115_p7, %s1466_s23, %s117_s30  }
  0x11   : > { %p254_p10 = pnand %p1042_p6, %p253_p9 }
  0x12   : > { %p298_p11 = scmp.lt.s32.totalorder (!%p254_p10), %s1470_s24, 1  ;;  %v310_v0 = vld [vmem:[%s1928_s1] sm:$0xff] (!%p254_p10)  ;;  %vm353_vm0 = vcmask (!%p254_p10), 261120   ;;  %vm326_vm1 = vcmask (!%p254_p10), 523264   ;;  %v311_v35 = vld [vmem:[%s1928_s1 + $0x8] sm:$0xff] (!%p254_p10)  ;;  %v312_v36 = vld [vmem:[%s1928_s1 + $0x10] sm:$0xff] (!%p254_p10) }
  0x13   : > { %257 = sbr.rel (%p254_p10) target bundleno = 661 (0x295), region = 32  ;;  %1134 = vmatprep.mubr.msk.f32.mxu1 (!%p254_p10), %vm353_vm0, %v310_v0  ;;  %v313_v37 = vld [vmem:[%s1928_s1 + $0x18] sm:$0xff] (!%p254_p10)  ;;  %v314_v38 = vld [vmem:[%s1928_s1 + $0x20] sm:$0xff] (!%p254_p10)  ;;  %v315_v39 = vld [vmem:[%s1928_s1 + $0x28] sm:$0xff] (!%p254_p10)  ;;  %v1480_v42 = vmov (!%p254_p10), 0.0|0.0   ;;  %vm1481_vm4 = vmmov (!%p254_p10), 0  }
  0x14   : > { %v316_v40 = vld [vmem:[%s1928_s1 + $0x30] sm:$0xff] (!%p254_p10)  ;;  %v317_v41 = vld [vmem:[%s1928_s1 + $0x38] sm:$0xff] (!%p254_p10)  ;;  %1211 = vmatprep.subr.bf16.mxu0 (!%p254_p10), %v1480_v42  ;;  %v318_v43 = vld [vmem:[%s1929_s2] sm:$0xff] (!%p254_p10)  ;;  %v1482_v44 = vmov (!%p254_p10), 0.0   ;;  %s1689_s8 = sand.u32 (!%p254_p10), 1, %s1462_s22   ;;  %s1766_s18 = sand.u32 (!%p254_p10), 1, %s1038_s27  }
  0x15   : > { %1184 = vmatprep.mubr.msk.f32.mxu0 (!%p254_p10), %vm1481_vm4, %v1482_v44  ;;  %s285_s11 = scalar_lea.vmem (!%p254_p10), [#allocation4], %s1689_s8  ;;  %s1769_s19 = sshll.u32 (!%p254_p10), %s1470_s24, 4 }
  0x16   : > { %s1775_s12 = scalar_lea.hbm (!%p254_p10), %s1931_s4, %s1769_s19  ;;  %s1485_s27 = smov (!%p254_p10), [#allocation4]  }
  0x17   : > { %s1312_s16 = sshll.u32 (!%p254_p10), %s1485_s27, 4  ;;  %s1313_s16 = int_to_ptr.vmem [resolvable:$false] %s1312_s16 }
  0x1a   : > { %s299_s13 = scalar_select %p298_p11, %s1470_s24, 1 }
  0x1c   : > { %s1091_s14 = sshll.u32 %s299_s13, 5  ;;  %s851_s13 = sshll.u32 %s285_s11, 4  ;;  %s852_s13 = int_to_ptr.vmem [resolvable:$true] %s851_s13 }
  0x1d   : > { %s305_s17 = scalar_lea.vmem %s1927_s0, %s1091_s14  ;;  %s813_s14 = scalar_lea.sflag [#allocation5], %s1766_s18 }
  0x1e   : > { %v306_v1 = vld [vmem:[%s305_s17] sm:$0xff]  ;;  %v307_v2 = vld [vmem:[%s305_s17 + $0x8] sm:$0xff]  ;;  %v308_v3 = vld [vmem:[%s305_s17 + $0x10] sm:$0xff]  ;;  %s1308_s15 = scalar_lea.vmem %s852_s13, 16  ;;  %p1315_p1 = scmp.lt.s32.totalorder %s852_s13, %s1313_s16 }
  0x1f   : > { %v309_v4 = vld [vmem:[%s305_s17 + $0x18] sm:$0xff]  ;;  %v322_v5 = vmul.f32 %v306_v1, %v306_v1  ;;  %v323_v6 = vmul.f32 %v307_v2, %v307_v2  ;;  %v324_v7 = vmul.f32 %v308_v3, %v308_v3  ;;  %p1309_p12 = scmp.ne.s32.totalorder %s852_s13, %s1308_s15  ;;  %s1314_s17 = scalar_lea.vmem %s1313_s16, 32 }
  0x20   : > { %v325_v8 = vmul.f32 %v309_v4, %v309_v4  ;;  %p1316_p2 = scmp.lt.s32.totalorder %s1314_s17, %s1308_s15 }
  0x21   : > { %v327_v9 = vsel %vm326_vm1, %v322_v5, 0.0  ;;  %v328_v10 = vsel %vm326_vm1, %v323_v6, 0.0  ;;  %v330_v11 = vsel %vm326_vm1, %v324_v7, 0.0  ;;  %v483_v5 = vlaneseq  ;;  %p1310_p13 = pnand %p1309_p12, %p1568_p4 }
  0x22   : > { %v329_v12 = vadd.f32 %v328_v10, %v327_v9  ;;  %v332_v13 = vsel %vm326_vm1, %v325_v8, 0.0  ;;  %p1317_p3 = por %p1316_p2, %p1315_p1 }
  0x23   : > { %v1652_v8 = vshrl.u32 %v483_v5, 7  ;;  %p1311_p0 = pneg %p1310_p13 }
  0x24   : > { %v331_v14 = vadd.f32 %v330_v11, %v329_v12 }
  0x25   : > { %v1655_v11 = vadd.s32 16, %v1652_v8  ;;  %v1658_v12 = vadd.s32 24, %v1652_v8  ;;  %p1318_p5 = pnand %p1317_p3, %p1311_p0 }
  0x26   : > { %v333_v15 = vadd.f32 %v332_v13, %v331_v14  ;;  %v1661_v13 = vadd.s32 48, %v1652_v8  ;;  %v1664_v14 = vadd.s32 56, %v1652_v8 }
  0x28   : > { %v334_v16 = vrot.slane %v333_v15, 4 }
  0x2a   : > { %v335_v17 = vadd.f32 %v334_v16, %v333_v15  ;;  %v485_v16 = vadd.s32 8, %v1652_v8 }
  0x2c   : > { %v336_v18 = vrot.slane %v335_v17, 2 }
  0x2e   : > { %v337_v19 = vadd.f32 %v336_v18, %v335_v17  ;;  %v1668_v17 = vadd.s32 32, %v1652_v8  ;;  %v1671_v18 = vadd.s32 40, %v1652_v8 }
  0x30   : > { %v338_v20 = vrot.slane %v337_v19, 1 }
  0x32   : > { %v339_v21 = vadd.f32 %v338_v20, %v337_v19 }
  0x34   : > { %1304 = vrsqrt.f32 %v339_v21  ;;  %vm342_vm2 = vcmp.eq.f32.partialorder %v339_v21, inf  ;;  %v345_v23 = vand.u32 2147483648, %v339_v21  ;;  %vm344_vm3 = vcmp.eq.f32.partialorder %v339_v21, 0.0 }
  0x3e   : > { %v1305_v22 = vpop.eup %1304 }
  0x3f   : > { %v341_v24 = vmul.f32 %v1305_v22, %v339_v21 }
  0x41   : > { %v343_v25 = vsel %vm342_vm2, %v339_v21, %v341_v24 }
  0x42   : > { %v346_v26 = vsel %vm344_vm3, %v345_v23, %v343_v25 }
  0x43   : > { %v347_v27 = vmax.f32 %v346_v26, 1e-12 }
  0x45   : > { %1306 = vrcp.f32 %v347_v27 }
  0x4f   : > { %v1307_v28 = vpop.eup %1306 }
  0x50   : > { %v1598_v29 = vmul.f32 %v1307_v28, %v306_v1  ;;  %v1600_v30 = vmul.f32 %v1307_v28, %v307_v2  ;;  %v1602_v31 = vmul.f32 %v1307_v28, %v308_v3  ;;  %v1604_v32 = vmul.f32 %v1307_v28, %v309_v4 }
  0x52   : > { %v1187_v33 = vpack.c.bf16 %v1600_v30, %v1598_v29  ;;  %v1191_v34 = vpack.c.bf16 %v1604_v32, %v1602_v31 }
  0x54   : > { %1188 = vmatprep.subr.bf16.mxu1 %v1187_v33 }
  0x55   : > { %1190 = vmatpush3.bf16.msra.mxu1 %v1187_v33 }
  0x56   : > { %1192 = vmatprep.subr.bf16.mxu1 %v1191_v34 }
  0x59   : > { %1194 = vmatpush3.bf16.msra.mxu1 %v1191_v34 }
  0x5c   : > { %1135 = vmatmul.mubr.msk.f32.vlgmr.msra.gmra.mrb[0].mxu1 %vm353_vm0, %v311_v35 }
  0x5d   : > { %1137 = vmatprep.mubr.msk.f32.mxu1 %vm353_vm0, %v312_v36 }
  0x60   : > { %1138 = vmatmul.mubr.msk.f32.gmra.mrb[2].mxu1 %vm353_vm0, %v313_v37 }
  0x61   : > { %1140 = vmatprep.mubr.msk.f32.mxu1 %vm353_vm0, %v314_v38 }
  0x64   : > { %1141 = vmatmul.mubr.msk.f32.gmra.mrb[4].mxu1 %vm353_vm0, %v315_v39 }
  0x65   : > { %1143 = vmatprep.mubr.msk.f32.mxu1 %vm353_vm0, %v316_v40 }
  0x68   : > { %1144 = vmatmul.mubr.msk.f32.gmra.mrb[6].mxu1 %vm353_vm0, %v317_v41 }
  0x69   : > { %1162 = vmatprep.mubr.msk.f32.mxu1 %vm326_vm1, %v318_v43 }
 0x12f   : > { %v1136_v45 = vpop.f32.mrb[0].mxu1 }
 0x130   : > { %v444_v46 = vpop.f32.mrb[1].mxu1  ;;  %v493_v50 = vsel %vm326_vm1, %v1136_v45, -inf }
 0x131   : > { %v492_v53 = vsel %vm326_vm1, %v444_v46, -inf }
 0x133   : > { %v1139_v47 = vpop.f32.mrb[2].mxu1 }
 0x134   : > { %v454_v48 = vpop.f32.mrb[3].mxu1  ;;  %v495_v58 = vsel %vm326_vm1, %v1139_v47, -inf }
 0x135   : > { %v494_v62 = vsel %vm326_vm1, %v454_v48, -inf }
 0x137   : > { %v1142_v49 = vpop.f32.mrb[4].mxu1 }
 0x138   : > { %v498_v51 = vsel %vm326_vm1, %v1142_v49, -inf  ;;  %v464_v52 = vpop.f32.mrb[5].mxu1 }
 0x139   : > { %v499_v54 = vmax.f32 %v493_v50, %v498_v51  ;;  %v496_v55 = vsel %vm326_vm1, %v464_v52, -inf }
 0x13a   : > { %v497_v56 = vmax.f32 %v492_v53, %v496_v55 }
 0x13b   : > { %v1145_v57 = vpop.f32.mrb[6].mxu1 }
 0x13c   : > { %v504_v59 = vmax.f32 %v497_v56, %v499_v54  ;;  %v502_v60 = vsel %vm326_vm1, %v1145_v57, -inf  ;;  %v474_v61 = vpop.f32.mrb[7].mxu1 }
 0x13d   : > { %v503_v63 = vmax.f32 %v495_v58, %v502_v60  ;;  %v500_v0 = vsel %vm326_vm1, %v474_v61, -inf }
 0x13e   : > { %v501_v1 = vmax.f32 %v494_v62, %v500_v0  ;;  %v319_v0 = vld [vmem:[%s1929_s2 + $0x8] sm:$0xff] }
 0x140   : > { %v505_v2 = vmax.f32 %v501_v1, %v503_v63  ;;  %v320_v1 = vld [vmem:[%s1929_s2 + $0x10] sm:$0xff] }
 0x142   : > { %v506_v3 = vmax.f32 %v504_v59, %v505_v2 }
 0x144   : > { %v507_v4 = vrot.slane %v506_v3, 4 }
 0x146   : > { %v508_v6 = vmax.f32 %v506_v3, %v507_v4  ;;  %v321_v3 = vld [vmem:[%s1929_s2 + $0x18] sm:$0xff] }
 0x148   : > { %v509_v7 = vrot.slane %v508_v6, 2 }
 0x14a   : > { %v510_v9 = vmax.f32 %v508_v6, %v509_v7  ;;  %v1484_v7 = vmov 1.0  }
 0x14c   : > { %v511_v10 = vrot.slane %v510_v9, 1 }
 0x14e   : > { %v512_v15 = vmax.f32 %v510_v9, %v511_v10 }
 0x150   : > { %vm515_vm5 = vcmp.eq.f32.partialorder %v454_v48, %v512_v15  ;;  %vm516_vm6 = vcmp.eq.f32.partialorder %v1139_v47, %v512_v15  ;;  %vm519_vm7 = vcmp.eq.f32.partialorder %v474_v61, %v512_v15  ;;  %vm520_vm8 = vcmp.eq.f32.partialorder %v1145_v57, %v512_v15 }
 0x151   : > { %v523_v19 = vsel %vm515_vm5, %v1655_v11, 64  ;;  %v524_v20 = vsel %vm516_vm6, %v1658_v12, 64  ;;  %v527_v21 = vsel %vm519_vm7, %v1661_v13, 64  ;;  %v528_v22 = vsel %vm520_vm8, %v1664_v14, 64 }
 0x152   : > { %v531_v23 = vsel %vm326_vm1, %v523_v19, 2147483647  ;;  %v532_v24 = vsel %vm326_vm1, %v524_v20, 2147483647  ;;  %v539_v25 = vsel %vm326_vm1, %v527_v21, 2147483647  ;;  %vm513_vm9 = vcmp.eq.f32.partialorder %v444_v46, %v512_v15 }
 0x153   : > { %vm540_vm10 = vcmp.lt.s32.totalorder %v531_v23, %v539_v25  ;;  %v542_v26 = vsel %vm326_vm1, %v528_v22, 2147483647  ;;  %vm514_vm11 = vcmp.eq.f32.partialorder %v1136_v45, %v512_v15  ;;  %vm517_vm12 = vcmp.eq.f32.partialorder %v464_v52, %v512_v15 }
 0x154   : > { %v541_v27 = vsel %vm540_vm10, %v531_v23, %v539_v25  ;;  %vm543_vm13 = vcmp.lt.s32.totalorder %v532_v24, %v542_v26  ;;  %vm518_vm14 = vcmp.eq.f32.partialorder %v1142_v49, %v512_v15  ;;  %v521_v28 = vsel %vm513_vm9, %v1652_v8, 64 }
 0x155   : > { %v544_v33 = vsel %vm543_vm13, %v532_v24, %v542_v26  ;;  %v522_v34 = vsel %vm514_vm11, %v485_v16, 64  ;;  %v525_v35 = vsel %vm517_vm12, %v1668_v17, 64  ;;  %v526_v36 = vsel %vm518_vm14, %v1671_v18, 64  ;;  %vm1696_vm13 = vmpackc.low %vm326_vm1, %vm326_vm1 }
 0x156   : > { %vm547_vm15 = vcmp.lt.s32.totalorder %v541_v27, %v544_v33  ;;  %v529_v37 = vsel %vm326_vm1, %v521_v28, 2147483647  ;;  %v530_v38 = vsel %vm326_vm1, %v522_v34, 2147483647  ;;  %v533_v39 = vsel %vm326_vm1, %v525_v35, 2147483647 }
 0x157   : > { %v548_v40 = vsel %vm547_vm15, %v541_v27, %v544_v33  ;;  %vm534_vm0 = vcmp.lt.s32.totalorder %v529_v37, %v533_v39  ;;  %v536_v41 = vsel %vm326_vm1, %v526_v36, 2147483647  ;;  %vm685_vm7 = vcmask 516096  }
 0x158   : > { %v535_v43 = vsel %vm534_vm0, %v529_v37, %v533_v39  ;;  %vm537_vm2 = vcmp.lt.s32.totalorder %v530_v38, %v536_v41  ;;  %v1483_v57 = vmov 1.0|1.0  }
 0x159   : > { %v538_v45 = vsel %vm537_vm2, %v530_v38, %v536_v41 }
 0x15a   : > { %vm545_vm3 = vcmp.lt.s32.totalorder %v535_v43, %v538_v45 }
 0x15b   : > { %v546_v46 = vsel %vm545_vm3, %v535_v43, %v538_v45 }
 0x15c   : > { %vm549_vm4 = vcmp.lt.s32.totalorder %v546_v46, %v548_v40 }
 0x15d   : > { %v550_v47 = vsel %vm549_vm4, %v546_v46, %v548_v40 }
 0x15e   : > { %v551_v48 = vrot.slane %v550_v47, 4 }
 0x160   : > { %vm552_vm5 = vcmp.lt.s32.totalorder %v550_v47, %v551_v48 }
 0x161   : > { %v553_v49 = vsel %vm552_vm5, %v550_v47, %v551_v48 }
 0x162   : > { %v554_v50 = vrot.slane %v553_v49, 2 }
 0x164   : > { %vm555_vm6 = vcmp.lt.s32.totalorder %v553_v49, %v554_v50 }
 0x165   : > { %v556_v51 = vsel %vm555_vm6, %v553_v49, %v554_v50 }
 0x166   : > { %v557_v52 = vrot.slane %v556_v51, 1 }
 0x168   : > { %vm558_vm8 = vcmp.lt.s32.totalorder %v556_v51, %v557_v52 }
 0x169   : > { %v559_v53 = vsel %vm558_vm8, %v556_v51, %v557_v52 }
 0x16a   : > { %vm560_vm9 = vcmp.eq.s32.totalorder %v1652_v8, %v559_v53  ;;  %vm561_vm10 = vcmp.eq.s32.totalorder %v485_v16, %v559_v53  ;;  %vm562_vm11 = vcmp.eq.s32.totalorder %v1655_v11, %v559_v53  ;;  %vm563_vm12 = vcmp.eq.s32.totalorder %v1658_v12, %v559_v53  ;;  %686 = vst.msk [vmem:[%s285_s11] sm:$0x1] %vm685_vm7, %v559_v53 }
 0x16b   : > { %vm1195_vm14 = vmpackc.low %vm561_vm10, %vm560_vm9  ;;  %v1054_v55 = vsel %vm560_vm9, 1.0, %v1482_v44  ;;  %v1055_v56 = vsel %vm561_vm10, 1.0, %v1482_v44  ;;  %vm564_vm0 = vcmp.eq.s32.totalorder %v1668_v17, %v559_v53  ;;  %vm565_vm2 = vcmp.eq.s32.totalorder %v1671_v18, %v559_v53 }
 0x16c   : > { %1196 = vmatprep.subr.msk.bf16.mxu1 %vm1195_vm14, %v1483_v57  ;;  %v1212_v58 = vpack.c.bf16 %v1055_v56, %v1054_v55  ;;  %vm1199_vm15 = vmpackc.low %vm563_vm12, %vm562_vm11  ;;  %v1056_v59 = vsel %vm562_vm11, 1.0, %v1482_v44  ;;  %v1057_v60 = vsel %vm563_vm12, 1.0, %v1482_v44  ;;  %vm566_vm4 = vcmp.eq.s32.totalorder %v1661_v13, %v559_v53 }
 0x16d   : > { %1198 = vmatpush3.bf16.msk.msra.mxu1 %vm1195_vm14, %v1483_v57  ;;  %vm1203_vm3 = vmpackc.low %vm565_vm2, %vm564_vm0  ;;  %vm567_vm5 = vcmp.eq.s32.totalorder %v1664_v14, %v559_v53  ;;  %v1216_v61 = vpack.c.bf16 %v1057_v60, %v1056_v59  ;;  %v1058_v62 = vsel %vm564_vm0, 1.0, %v1482_v44  ;;  %v1059_v63 = vsel %vm565_vm2, 1.0, %v1482_v44 }
 0x16e   : > { %1200 = vmatprep.subr.msk.bf16.mxu1 %vm1199_vm15, %v1483_v57  ;;  %1214 = vmatpush3.bf16.xpose.msk.msra.mxu0 %vm1696_vm13, %v1212_v58  ;;  %vm1207_vm6 = vmpackc.low %vm567_vm5, %vm566_vm4  ;;  %v1220_v2 = vpack.c.bf16 %v1059_v63, %v1058_v62  ;;  %v1060_v4 = vsel %vm566_vm4, 1.0, %v1482_v44  ;;  %v1061_v5 = vsel %vm567_vm5, 1.0, %v1482_v44 }
 0x16f   : > { %1215 = vmatprep.subr.bf16.mxu0 %v1480_v42  ;;  %v1224_v6 = vpack.c.bf16 %v1061_v5, %v1060_v4 }
 0x171   : > { %1202 = vmatpush3.bf16.msk.msra.mxu1 %vm1199_vm15, %v1483_v57 }
 0x172   : > { %1204 = vmatprep.subr.msk.bf16.mxu1 %vm1203_vm3, %v1483_v57 }
 0x175   : > { %1206 = vmatpush3.bf16.msk.msra.mxu1 %vm1203_vm3, %v1483_v57 }
 0x176   : > { %1208 = vmatprep.subr.msk.bf16.mxu1 %vm1207_vm6, %v1483_v57  ;;  %1218 = vmatpush3.bf16.xpose.msk.msra.mxu0 %vm1696_vm13, %v1216_v61 }
 0x177   : > { %1219 = vmatprep.subr.bf16.mxu0 %v1480_v42 }
 0x179   : > { %1210 = vmatpush3.bf16.msk.msra.mxu1 %vm1207_vm6, %v1483_v57 }
 0x17c   : > { %1163 = vmatmul.mubr.msk.f32.vlgmr.msra.gmra.mrb[8].mxu1 %vm326_vm1, %v319_v0 }
 0x17d   : > { %1165 = vmatprep.mubr.msk.f32.mxu1 %vm326_vm1, %v320_v1 }
 0x17e   : > { %1222 = vmatpush3.bf16.xpose.msk.msra.mxu0 %vm1696_vm13, %v1220_v2 }
 0x17f   : > { %1223 = vmatprep.subr.bf16.mxu0 %v1480_v42 }
 0x180   : > { %1166 = vmatmul.mubr.msk.f32.gmra.mrb[10].mxu1 %vm326_vm1, %v321_v3 }
 0x186   : > { %1226 = vmatpush3.bf16.xpose.msk.msra.mxu0 %vm1696_vm13, %v1224_v6 }
 0x18d   : > { %1185 = vmatmul.mubr.msk.f32.vlgmr.msra.gmra.mrb[0].mxu0 %vm326_vm1, %v1484_v7 }
 0x18e   : > { %1321 = shalt.err (!%p1318_p5)
}
 0x18f   : > { %s1322_s11 = scalar_lea.hbm %s1775_s12, 16  ;;  %s1326_s27 = scalar_lea.hbm %s1931_s4, 32 }
 0x190   : > { %p1323_p6 = scmp.ne.s32.totalorder %s1775_s12, %s1322_s11  ;;  %p1327_p10 = scmp.lt.u32.totalorder %s1775_s12, %s1931_s4 }
 0x191   : > { %p1328_p11 = scmp.lt.u32.totalorder %s1326_s27, %s1322_s11  ;;  %p1330_p13 = scmp.lt.u32.totalorder %s1322_s11, %s1775_s12 }
 0x192   : > { %p1324_p7 = pnand %p1323_p6, %p1568_p4 }
 0x193   : > { %p1329_p12 = por %p1328_p11, %p1327_p10 }
 0x194   : > { %p1325_p9 = pneg %p1324_p7 }
 0x195   : > { %p1331_p0 = por %p1330_p13, %p1329_p12 }
 0x197   : > { %p1332_p1 = pnand %p1331_p0, %p1325_p9 }
 0x199   : > { %1335 = shalt.err (!%p1332_p1)
}
 0x19a   : > { %1228 = dma.vmem_to_hbm [thread:$0]  (%p1568_p4), %s852_s13, 16, %s1775_s12, %s813_s14  }
 0x19b   : > { %s1043_s15 = sshll.u32 %s1689_s8, 5  ;;  %s1092_s28 = sshll.u32 %s1470_s24, 9 }
 0x19c   : > { %s279_s17 = scalar_lea.vmem [#allocation2], %s1043_s15  ;;  %s1810_s11 = scalar_lea.hbm %s1930_s3, %s1092_s28 }
 0x19d   : > { %s834_s20 = sshll.u32 %s279_s17, 4  ;;  %s808_s24 = scalar_lea.sflag [#allocation3], %s1689_s8  ;;  %s1803_s20 = int_to_ptr.vmem [resolvable:$true] %s834_s20 }
 0x19e   : > { %s1336_s30 = scalar_lea.vmem %s1803_s20, 512  ;;  %s1486_s27 = smov [#allocation2]  }
 0x19f   : > { %p1337_p2 = scmp.ne.s32.totalorder %s1803_s20, %s1336_s30  ;;  %s1340_s16 = sshll.u32 %s1486_s27, 4  ;;  %s1341_s16 = int_to_ptr.vmem [resolvable:$false] %s1340_s16 }
 0x1a0   : > { %s1342_s15 = scalar_lea.vmem %s1341_s16, 1024  ;;  %p1343_p6 = scmp.lt.s32.totalorder %s1803_s20, %s1341_s16 }
 0x1a1   : > { %p1338_p3 = pnand %p1337_p2, %p1568_p4  ;;  %p1344_p7 = scmp.lt.s32.totalorder %s1342_s15, %s1336_s30 }
 0x1a3   : > { %p1339_p5 = pneg %p1338_p3  ;;  %p1345_p9 = por %p1344_p7, %p1343_p6 }
 0x1a5   : > { %p1346_p10 = pnand %p1345_p9, %p1339_p5 }
 0x24f   : > { %v1164_v42 = vpop.f32.mrb[8].mxu1 }
 0x250   : > { %682 = vst.msk [vmem:[%s279_s17 + $0x8] sm:$0xff] %vm326_vm1, %v1164_v42  ;;  %v688_v44 = vsub.f32 %v1164_v42, %v1600_v30  ;;  %v662_v8 = vpop.f32.mrb[9].mxu1 }
 0x251   : > { %681 = vst.msk [vmem:[%s279_s17] sm:$0xff] %vm326_vm1, %v662_v8  ;;  %v687_v9 = vsub.f32 %v662_v8, %v1598_v29 }
 0x252   : > { %v692_v10 = vmul.f32 %v688_v44, %v688_v44 }
 0x253   : > { %v691_v11 = vmul.f32 %v687_v9, %v687_v9  ;;  %v1167_v12 = vpop.f32.mrb[10].mxu1 }
 0x254   : > { %v696_v30 = vsel %vm326_vm1, %v692_v10, 0.0  ;;  %684 = vst.msk [vmem:[%s279_s17 + $0x18] sm:$0xff] %vm326_vm1, %v1167_v12  ;;  %v690_v13 = vsub.f32 %v1167_v12, %v1604_v32  ;;  %v672_v14 = vpop.f32.mrb[11].mxu1 }
 0x255   : > { %v695_v15 = vsel %vm326_vm1, %v691_v11, 0.0  ;;  %683 = vst.msk [vmem:[%s279_s17 + $0x10] sm:$0xff] %vm326_vm1, %v672_v14  ;;  %v689_v29 = vsub.f32 %v672_v14, %v1602_v31 }
 0x256   : > { %v697_v16 = vadd.f32 %v696_v30, %v695_v15 }
 0x257   : > { %1349 = shalt.err (!%p1346_p10)
}
 0x258   : > { %s1350_s17 = scalar_lea.hbm %s1810_s11, 512  ;;  %s1354_s13 = scalar_lea.hbm %s1930_s3, 1024 }
 0x259   : > { %p1351_p11 = scmp.ne.s32.totalorder %s1810_s11, %s1350_s17  ;;  %p1355_p0 = scmp.lt.u32.totalorder %s1810_s11, %s1930_s3 }
 0x25a   : > { %p1356_p1 = scmp.lt.u32.totalorder %s1354_s13, %s1350_s17  ;;  %p1358_p3 = scmp.lt.u32.totalorder %s1350_s17, %s1810_s11 }
 0x25b   : > { %p1352_p12 = pnand %p1351_p11, %p1568_p4 }
 0x25c   : > { %p1357_p2 = por %p1356_p1, %p1355_p0 }
 0x25d   : > { %p1353_p13 = pneg %p1352_p12 }
 0x25e   : > { %p1359_p5 = por %p1358_p3, %p1357_p2 }
 0x260   : > { %p1360_p6 = pnand %p1359_p5, %p1353_p13 }
 0x262   : > { %1363 = shalt.err (!%p1360_p6)
}
 0x263   : > { %s1487_s30 = smov 128   ;;  %s1488_s15 = smov 8   ;;  %v694_v31 = vmul.f32 %v690_v13, %v690_v13  ;;  %v693_v32 = vmul.f32 %v689_v29, %v689_v29  ;;  %v802_v23 = vpop.f32.mrb[0].mxu0 }
 0x264   : > { %1227 = dma.vmem_to_hbm [thread:$0]  (%p1568_p4), %s1803_s20, 512, %s1810_s11, %s808_s24, %s1487_s30, %s1487_s30, %s1488_s15   ;;  %v1186_v24 = vpop.f32.mrb[1].mxu0 }
 0x265   : > { %v698_v17 = vsel %vm326_vm1, %v693_v32, 0.0  ;;  %v700_v19 = vsel %vm326_vm1, %v694_v31, 0.0  ;;  %s297_s17 = scalar_lea.vmem [#allocation7], %s1689_s8  ;;  %s1849_s27 = scalar_lea.hbm %s1933_s6, %s1769_s19 }
 0x266   : > { %v699_v18 = vadd.f32 %v698_v17, %v697_v16  ;;  %s879_s28 = sshll.u32 %s297_s17, 4  ;;  %806 = vst.msk [vmem:[%s297_s17] sm:$0x1] %vm685_vm7, %v802_v23  ;;  %s821_s20 = scalar_lea.sflag [#allocation8], %s1689_s8  ;;  %s1851_s28 = int_to_ptr.vmem [resolvable:$true] %s879_s28 }
 0x267   : > { %s1364_s11 = scalar_lea.vmem %s1851_s28, 16  ;;  %s1489_s24 = smov [#allocation7]  }
 0x268   : > { %v701_v20 = vadd.f32 %v700_v19, %v699_v18  ;;  %p1365_p7 = scmp.ne.s32.totalorder %s1851_s28, %s1364_s11  ;;  %s1368_s16 = sshll.u32 %s1489_s24, 4  ;;  %s1369_s16 = int_to_ptr.vmem [resolvable:$false] %s1368_s16 }
 0x269   : > { %s1370_s30 = scalar_lea.vmem %s1369_s16, 32  ;;  %p1371_p11 = scmp.lt.s32.totalorder %s1851_s28, %s1369_s16 }
 0x26a   : > { %v702_v21 = vrot.slane %v701_v20, 4  ;;  %p1366_p9 = pnand %p1365_p7, %p1568_p4  ;;  %p1372_p12 = scmp.lt.s32.totalorder %s1370_s30, %s1364_s11 }
 0x26c   : > { %v703_v22 = vadd.f32 %v702_v21, %v701_v20  ;;  %p1367_p10 = pneg %p1366_p9  ;;  %p1373_p13 = por %p1372_p12, %p1371_p11 }
 0x26e   : > { %v704_v25 = vrot.slane %v703_v22, 2  ;;  %p1374_p0 = pnand %p1373_p13, %p1367_p10 }
 0x270   : > { %1377 = shalt.err (!%p1374_p0)
}
 0x271   : > { %s1378_s15 = scalar_lea.hbm %s1849_s27, 16  ;;  %s1382_s13 = scalar_lea.hbm %s1933_s6, 32 }
 0x272   : > { %p1379_p1 = scmp.ne.s32.totalorder %s1849_s27, %s1378_s15  ;;  %p1383_p5 = scmp.lt.u32.totalorder %s1849_s27, %s1933_s6 }
 0x273   : > { %p1384_p6 = scmp.lt.u32.totalorder %s1382_s13, %s1378_s15  ;;  %p1386_p9 = scmp.lt.u32.totalorder %s1378_s15, %s1849_s27 }
 0x274   : > { %p1380_p2 = pnand %p1379_p1, %p1568_p4 }
 0x275   : > { %p1385_p7 = por %p1384_p6, %p1383_p5 }
 0x276   : > { %p1381_p3 = pneg %p1380_p2 }
 0x277   : > { %p1387_p10 = por %p1386_p9, %p1385_p7 }
 0x279   : > { %p1388_p11 = pnand %p1387_p10, %p1381_p3 }
 0x27b   : > { %1391 = shalt.err (!%p1388_p11)
}
 0x27c   : > { %1230 = dma.vmem_to_hbm [thread:$0]  (%p1568_p4), %s1851_s28, 16, %s1849_s27, %s821_s20   ;;  %v705_v26 = vadd.f32 %v704_v25, %v703_v22 }
 0x27d   : > { %s291_s11 = scalar_lea.vmem [#allocation6], %s1689_s8  ;;  %s1881_s15 = scalar_lea.hbm %s1932_s5, %s1769_s19 }
 0x27e   : > { %s865_s30 = sshll.u32 %s291_s11, 4  ;;  %v706_v27 = vrot.slane %v705_v26, 1  ;;  %s1490_s24 = smov [#allocation6]   ;;  %s866_s30 = int_to_ptr.vmem [resolvable:$true] %s865_s30 }
 0x27f   : > { %s1392_s13 = scalar_lea.vmem %s866_s30, 16  ;;  %s1396_s28 = sshll.u32 %s1490_s24, 4  ;;  %s1397_s28 = int_to_ptr.vmem [resolvable:$false] %s1396_s28 }
 0x280   : > { %v707_v28 = vadd.f32 %v706_v27, %v705_v26  ;;  %p1393_p12 = scmp.ne.s32.totalorder %s866_s30, %s1392_s13  ;;  %s1398_s8 = scalar_lea.vmem %s1397_s28, 32 }
 0x281   : > { %p1399_p1 = scmp.lt.s32.totalorder %s866_s30, %s1397_s28  ;;  %p1400_p2 = scmp.lt.s32.totalorder %s1398_s8, %s1392_s13 }
 0x282   : > { %708 = vst.msk [vmem:[%s291_s11] sm:$0x1] %vm685_vm7, %v707_v28  ;;  %p1394_p13 = pnand %p1393_p12, %p1568_p4 }
 0x283   : > { %p1401_p3 = por %p1400_p2, %p1399_p1 }
 0x284   : > { %p1395_p0 = pneg %p1394_p13 }
 0x286   : > { %p1402_p5 = pnand %p1401_p3, %p1395_p0 }
 0x288   : > { %1405 = shalt.err (!%p1402_p5)
}
 0x289   : > { %s1406_s19 = scalar_lea.hbm %s1881_s15, 16  ;;  %s1410_s16 = scalar_lea.hbm %s1932_s5, 32 }
 0x28a   : > { %p1407_p6 = scmp.ne.s32.totalorder %s1881_s15, %s1406_s19  ;;  %p1411_p10 = scmp.lt.u32.totalorder %s1881_s15, %s1932_s5 }
 0x28b   : > { %p1412_p11 = scmp.lt.u32.totalorder %s1410_s16, %s1406_s19  ;;  %p1414_p13 = scmp.lt.u32.totalorder %s1406_s19, %s1881_s15 }
 0x28c   : > { %p1408_p7 = pnand %p1407_p6, %p1568_p4 }
 0x28d   : > { %p1413_p12 = por %p1412_p11, %p1411_p10 }
 0x28e   : > { %p1409_p9 = pneg %p1408_p7 }
 0x28f   : > { %p1415_p0 = por %p1414_p13, %p1413_p12 }
 0x291   : > { %p1416_p1 = pnand %p1415_p0, %p1409_p9 }
 0x293   : > { %1419 = shalt.err (!%p1416_p1)
}
 0x294   : > { %1229 = dma.vmem_to_hbm [thread:$0]  (%p1568_p4), %s866_s30, 16, %s1881_s15, %s813_s14  }
 0x295 PF: > { %p1248_p2 = scmp.ge.s32.totalorder %s1478_s26, 2  ;;  %s891_s12 = sand.u32 1, %s1458_s21  }
 0x296   : > { %s892_s13 = scalar_lea.sflag [#allocation3], %s891_s12 }
 0x297   : > { %p1236_p3 = pnand %p1248_p2, %p1577_p8 }
 0x299   : > { %1445 = dma.done.wait (!%p1236_p3), %s892_s13, 512  }
 0x29a   : > { %1447 = vsyncadd (!%p1236_p3), %s892_s13, 4294966784  ;;  %s1939_s24 = sadd.s32 4294967294, %s1478_s26  }
 0x29b   : > { %s900_s28 = sand.u32 1, %s1939_s24  }
 0x29c   : > { %s901_s8 = scalar_lea.sflag [#allocation5], %s900_s28 }
 0x29d   : > { %1449 = dma.done.wait (!%p1236_p3), %s901_s8, 32  }
 0x29e   : > { %1451 = vsyncadd (!%p1236_p3), %s901_s8, 4294967264  ;;  %s917_s7 = scalar_lea.sflag [#allocation8], %s891_s12 }
 0x29f   : > { %1453 = dma.done.wait (!%p1236_p3), %s917_s7, 16  }
 0x2a0   : > { %1455 = vsyncadd (!%p1236_p3), %s917_s7, 4294967280  ;;  %s26_s26 = sadd.s32 1, %s1478_s26   ;;  %s1940_s21 = smov %s1462_s22 }
 0x2a1   : > { %p23_p4 = scmp.ge.s32.totalorder %s26_s26, 4   ;;  %s1941_s22 = smov %s1466_s23 }
 0x2a2   : > { %s1942_s23 = smov %s1583_s10  ;;  %s1943_s24 = smov %s1474_s25 }
 0x2a3   : > { %s1944_s25 = smov %s1946_s29  ;;  %25 = sbr.rel (!%p23_p4) target bundleno = 8 (0x8), region = 116 }
 0x2aa   :  { %921 = vsyncpa [#allocation3], 1 }
 0x2ab   :  { %923 = vsyncpa [#allocation3 + $0x1], 1 }
 0x2ac   :  { %924 = vsyncpa [#allocation5], 1 }
 0x2ad   :  { %926 = vsyncpa [#allocation5 + $0x1], 1 }
 0x2ae   :  { %927 = vsyncpa [#allocation8], 1 }
 0x2af   :  { %929 = vsyncpa [#allocation8 + $0x1], 1 }

</bundles_post_ra>
